<compile_context>
chip_gen: v7x
topology: tpu7x:2x2x1
jax: 0.10.0
libtpu: 0.0.40
codegen_flags: <defaults>
</compile_context>

<pallas_src>
import jax
import jax.numpy as jnp
from jax.experimental import pallas as pl
from jax.experimental.pallas import tpu as pltpu


def _round_up(a, b):
    return (a + b - 1) // b * b


def _upsample1d_kernel(x_ref, halo_ref, we_ref, wo_ref, b_ref, out_ref, x3_ref):
    # x_ref   : (1, TL, Cp)    input rows of this tile (channels-last)
    # halo_ref: (1, 1, 2, Cp)  [row before tile, row after tile] (0 at edges)
    # we_ref  : (2*Cp, Cp)     [W_k3; W_k1]  contracts against [x_prev | x]
    # wo_ref  : (2*Cp, Cp)     [W_k2; W_k0]  contracts against [x | x_next]
    # b_ref   : (1, Cp)
    # out_ref : (1, TL, 2*Cp)  [even | odd] lane-concatenated output slab
    # x3_ref  : (TL, 3*Cp)     VMEM scratch holding [x_prev | x | x_next]
    TL = x_ref.shape[1]
    Cp = x_ref.shape[2]

    x = x_ref[0]                     # (TL, Cp)
    halo = halo_ref[0, 0]            # (2, Cp)

    # middle slab: x itself
    x3_ref[:, Cp:2 * Cp] = x
    # left slab:  x_prev[i] = x[i-1]  (row 0 comes from the halo)
    x3_ref[0:1, 0:Cp] = halo[0:1, :]
    x3_ref[1:TL, 0:Cp] = x[0:TL - 1, :]
    # right slab: x_next[i] = x[i+1]  (last row comes from the halo)
    x3_ref[0:TL - 1, 2 * Cp:3 * Cp] = x[1:TL, :]
    x3_ref[TL - 1:TL, 2 * Cp:3 * Cp] = halo[1:2, :]

    b = b_ref[...]                   # (1, Cp), broadcasts over rows
    ye = jnp.dot(x3_ref[:, 0:2 * Cp], we_ref[...],
                 preferred_element_type=jnp.float32) + b
    yo = jnp.dot(x3_ref[:, Cp:3 * Cp], wo_ref[...],
                 preferred_element_type=jnp.float32) + b

    out_ref[0, :, 0:Cp] = ye.astype(out_ref.dtype)
    out_ref[0, :, Cp:] = yo.astype(out_ref.dtype)


def upsample1d(x, weight, bias, *, tile_rows=None):
    """x: (N, C, L). weight: (C_in, C_out, 4) (PyTorch ConvTranspose1d layout).
    bias: (C,).  Returns (N, C, 2*L), matching nn.ConvTranspose1d(dim, dim, 4, 2, 1)."""
    N, C, L = x.shape
    assert weight.shape == (C, C, 4)
    dtype = x.dtype

    Cp = _round_up(C, 128)          # lane-dense channel count
    C2 = 2 * Cp

    # ---- tile size: as many rows as comfortably fit the scoped VMEM budget ----
    if tile_rows is None:
        # x block + out block (double-buffered) + combined scratch slab
        row_bytes = (Cp + C2) * 4 * 2 + 3 * Cp * 4
        tile_rows = max(8, min(1024, (6 * 1024 * 1024) // row_bytes))
    TL = max(8, (min(tile_rows, _round_up(L, 8)) // 8) * 8)
    Lp = _round_up(L, TL)
    T = Lp // TL

    # ---- layout glue: NCL -> (N, Lp, Cp) channels-last, zero padded ----
    x_nlc = jnp.transpose(x, (0, 2, 1))
    x_p = jnp.pad(x_nlc, ((0, 0), (0, Lp - L), (0, Cp - C)))

    # ---- tiny per-tile halo rows (2 rows / tile), zero at sample boundaries ----
    zrow = jnp.zeros((N, 1, Cp), dtype)
    if T > 1:
        prev_rows = x_p[:, TL - 1:Lp - 1:TL, :]     # rows TL-1, 2TL-1, ...
        next_rows = x_p[:, TL:Lp:TL, :]             # rows TL, 2TL, ...
        prev_halo = jnp.concatenate([zrow, prev_rows], axis=1)   # (N, T, Cp)
        next_halo = jnp.concatenate([next_rows, zrow], axis=1)   # (N, T, Cp)
    else:
        prev_halo = zrow
        next_halo = zrow
    halos = jnp.stack([prev_halo, next_halo], axis=2)            # (N, T, 2, Cp)

    # ---- stacked weight taps: one matmul per output parity ----
    w_p = jnp.pad(weight.astype(dtype), ((0, Cp - C), (0, Cp - C), (0, 0)))
    w_even = jnp.concatenate([w_p[:, :, 3], w_p[:, :, 1]], axis=0)   # (2Cp, Cp) for [x_prev|x]
    w_odd = jnp.concatenate([w_p[:, :, 2], w_p[:, :, 0]], axis=0)    # (2Cp, Cp) for [x|x_next]
    b_p = jnp.pad(bias.astype(jnp.float32), (0, Cp - C)).reshape(1, Cp)

    flops = 2 * 2 * (N * Lp) * C2 * Cp
    bytes_accessed = 4 * (N * Lp * Cp + N * T * 2 * Cp + 2 * C2 * Cp + Cp
                          + N * Lp * C2)

    out = pl.pallas_call(
        _upsample1d_kernel,
        out_shape=jax.ShapeDtypeStruct((N, Lp, C2), dtype),
        grid=(N, T),
        in_specs=[
            pl.BlockSpec((1, TL, Cp), lambda n, t: (n, t, 0)),
            pl.BlockSpec((1, 1, 2, Cp), lambda n, t: (n, t, 0, 0)),
            pl.BlockSpec((C2, Cp), lambda n, t: (0, 0)),
            pl.BlockSpec((C2, Cp), lambda n, t: (0, 0)),
            pl.BlockSpec((1, Cp), lambda n, t: (0, 0)),
        ],
        out_specs=pl.BlockSpec((1, TL, C2), lambda n, t: (n, t, 0)),
        scratch_shapes=[pltpu.VMEM((TL, 3 * Cp), dtype)],
        compiler_params=pltpu.CompilerParams(
            dimension_semantics=("parallel", "parallel"),
            vmem_limit_bytes=32 * 1024 * 1024,
        ),
        cost_estimate=pl.CostEstimate(
            flops=flops, transcendentals=0, bytes_accessed=bytes_accessed),
    )(x_p, halos, w_even, w_odd, b_p)

    # ---- de-interleave (free reshape) + strip padding, back to NCL ----
    y = out[:, :L, :].reshape(N, L, 2, Cp)[:, :, :, :C]   # (N, L, 2, C)
    y = y.reshape(N, 2 * L, C)
    return jnp.transpose(y, (0, 2, 1))                    # (N, C, 2L)


def _reference_conv_transpose1d(x, weight, bias):
    """Direct (slow) reference implementing PyTorch ConvTranspose1d semantics."""
    N, C, L = x.shape
    Lo = 2 * L
    y = jnp.broadcast_to(bias[None, :, None], (N, C, Lo)).astype(jnp.float32)
    for l in range(L):
        for k in range(4):
            t = 2 * l - 1 + k
            if 0 <= t < Lo:
                y = y.at[:, :, t].add(
                    jnp.einsum('ni,io->no', x[:, :, l], weight[:, :, k]))
    return y


if __name__ == "__main__":
    key = jax.random.PRNGKey(0)
    k_x, k_w, k_b, k_x2 = jax.random.split(key, 4)

    dim = 8      # channels
    fan = dim * 4
    bound = 1.0 / (fan ** 0.5)
    weight = jax.random.uniform(k_w, (dim, dim, 4), jnp.float32, -bound, bound)
    bias = jax.random.uniform(k_b, (dim,), jnp.float32, -bound, bound)

    # Case 1: default tiling (one row-tile per sample).
    N, L = 2, 16
    x = jax.random.normal(k_x, (N, dim, L), jnp.float32)
    y = jax.block_until_ready(upsample1d(x, weight, bias))
    assert y.shape == (N, dim, 2 * L), y.shape
    y_ref = _reference_conv_transpose1d(x, weight, bias)
    assert jnp.allclose(y, y_ref, atol=1e-5, rtol=1e-5), \
        float(jnp.max(jnp.abs(y - y_ref)))

    # Case 2: force multiple row-tiles per sample (exercises the halo path)
    # with a length that is not a multiple of the tile.
    N2, L2 = 2, 12
    x2 = jax.random.normal(k_x2, (N2, dim, L2), jnp.float32)
    y2 = jax.block_until_ready(upsample1d(x2, weight, bias, tile_rows=8))
    assert y2.shape == (N2, dim, 2 * L2), y2.shape
    y2_ref = _reference_conv_transpose1d(x2, weight, bias)
    assert jnp.allclose(y2, y2_ref, atol=1e-5, rtol=1e-5), \
        float(jnp.max(jnp.abs(y2 - y2_ref)))

    print("KERNEL_OK")
</pallas_src>

<mosaic_0001>
module attributes {stable_mosaic.version = 11 : i64} {
  func.func @_upsample1d_kernel(%arg0: i32, %arg1: i32, %arg2: memref<1x16x128xf32, #tpu.memory_space<vmem>>, %arg3: memref<1x1x2x128xf32, #tpu.memory_space<vmem>>, %arg4: memref<256x128xf32, #tpu.memory_space<vmem>>, %arg5: memref<256x128xf32, #tpu.memory_space<vmem>>, %arg6: memref<1x128xf32, #tpu.memory_space<vmem>>, %arg7: memref<1x16x256xf32, #tpu.memory_space<vmem>>, %arg8: memref<16x384xf32, #tpu.memory_space<vmem>>) attributes {dimension_semantics = [#tpu.dimension_semantics<parallel>, #tpu.dimension_semantics<parallel>], iteration_bounds = array<i64: 2, 1>, scalar_prefetch = 0 : i64, scratch_operands = 1 : i64, tpu.core_type = #tpu.core_type<tc>, window_params = [{transform_indices = @transform_0, window_bounds = array<i64: 1, 16, 128>}, {transform_indices = @transform_1, window_bounds = array<i64: 1, 1, 2, 128>}, {pipeline_mode = #tpu.pipeline_mode<synchronous>, transform_indices = @transform_2, window_bounds = array<i64: 256, 128>}, {pipeline_mode = #tpu.pipeline_mode<synchronous>, transform_indices = @transform_3, window_bounds = array<i64: 256, 128>}, {pipeline_mode = #tpu.pipeline_mode<synchronous>, transform_indices = @transform_4, window_bounds = array<i64: 1, 128>}, {transform_indices = @transform_5, window_bounds = array<i64: 1, 16, 256>}]} {
    %c0 = arith.constant 0 : index
    %c0_0 = arith.constant 0 : index
    %c0_1 = arith.constant 0 : index
    %0 = vector.load %arg2[%c0, %c0_0, %c0_1] : memref<1x16x128xf32, #tpu.memory_space<vmem>>, vector<1x16x128xf32>
    %1 = vector.shape_cast %0 : vector<1x16x128xf32> to vector<16x128xf32>
    %c0_2 = arith.constant 0 : index
    %c0_3 = arith.constant 0 : index
    %c0_4 = arith.constant 0 : index
    %c0_5 = arith.constant 0 : index
    %2 = vector.load %arg3[%c0_2, %c0_3, %c0_4, %c0_5] : memref<1x1x2x128xf32, #tpu.memory_space<vmem>>, vector<1x1x2x128xf32>
    %3 = vector.shape_cast %2 : vector<1x1x2x128xf32> to vector<2x128xf32>
    %c0_6 = arith.constant 0 : index
    %c128 = arith.constant 128 : index
    %4 = vector.load %arg8[%c0_6, %c128] : memref<16x384xf32, #tpu.memory_space<vmem>>, vector<16x128xf32>
    tpu.vector_store %arg8[%c0_6, %c128], %1 {strides = array<i32>} : memref<16x384xf32, #tpu.memory_space<vmem>>, vector<16x128xf32>,
    %5 = vector.extract_strided_slice %3 {offsets = [0, 0], sizes = [1, 128], strides = [1, 1]} : vector<2x128xf32> to vector<1x128xf32>
    %c0_7 = arith.constant 0 : index
    %c0_8 = arith.constant 0 : index
    %6 = vector.load %arg8[%c0_7, %c0_8] : memref<16x384xf32, #tpu.memory_space<vmem>>, vector<1x128xf32>
    tpu.vector_store %arg8[%c0_7, %c0_8], %5 {strides = array<i32>} : memref<16x384xf32, #tpu.memory_space<vmem>>, vector<1x128xf32>,
    %7 = vector.extract_strided_slice %1 {offsets = [0, 0], sizes = [15, 128], strides = [1, 1]} : vector<16x128xf32> to vector<15x128xf32>
    %c1 = arith.constant 1 : index
    %c0_9 = arith.constant 0 : index
    %8 = vector.load %arg8[%c1, %c0_9] : memref<16x384xf32, #tpu.memory_space<vmem>>, vector<15x128xf32>
    tpu.vector_store %arg8[%c1, %c0_9], %7 {strides = array<i32>} : memref<16x384xf32, #tpu.memory_space<vmem>>, vector<15x128xf32>,
    %9 = vector.extract_strided_slice %1 {offsets = [1, 0], sizes = [15, 128], strides = [1, 1]} : vector<16x128xf32> to vector<15x128xf32>
    %c0_10 = arith.constant 0 : index
    %c256 = arith.constant 256 : index
    %10 = vector.load %arg8[%c0_10, %c256] : memref<16x384xf32, #tpu.memory_space<vmem>>, vector<15x128xf32>
    tpu.vector_store %arg8[%c0_10, %c256], %9 {strides = array<i32>} : memref<16x384xf32, #tpu.memory_space<vmem>>, vector<15x128xf32>,
    %11 = vector.extract_strided_slice %3 {offsets = [1, 0], sizes = [1, 128], strides = [1, 1]} : vector<2x128xf32> to vector<1x128xf32>
    %c15 = arith.constant 15 : index
    %c256_11 = arith.constant 256 : index
    %12 = vector.load %arg8[%c15, %c256_11] : memref<16x384xf32, #tpu.memory_space<vmem>>, vector<1x128xf32>
    tpu.vector_store %arg8[%c15, %c256_11], %11 {strides = array<i32>} : memref<16x384xf32, #tpu.memory_space<vmem>>, vector<1x128xf32>,
    %c0_12 = arith.constant 0 : index
    %c0_13 = arith.constant 0 : index
    %13 = vector.load %arg6[%c0_12, %c0_13] : memref<1x128xf32, #tpu.memory_space<vmem>>, vector<1x128xf32>
    %c0_14 = arith.constant 0 : index
    %c0_15 = arith.constant 0 : index
    %14 = vector.load %arg8[%c0_14, %c0_15] : memref<16x384xf32, #tpu.memory_space<vmem>>, vector<16x256xf32>
    %c0_16 = arith.constant 0 : index
    %c0_17 = arith.constant 0 : index
    %15 = vector.load %arg4[%c0_16, %c0_17] : memref<256x128xf32, #tpu.memory_space<vmem>>, vector<256x128xf32>
    %cst = arith.constant dense<0.000000e+00> : vector<16x128xf32>
    %16 = tpu.matmul %14, %15, %cst {dimension_numbers = #tpu.dot_dimension_numbers<[1], [0], [0], [1], [0, 0, 1, 1], [], []>} : vector<16x256xf32>, vector<256x128xf32>, vector<16x128xf32> -> vector<16x128xf32>
    %17 = vector.broadcast %13 : vector<1x128xf32> to vector<16x128xf32>
    %18 = arith.addf %16, %17 : vector<16x128xf32>
    %c0_18 = arith.constant 0 : index
    %c128_19 = arith.constant 128 : index
    %19 = vector.load %arg8[%c0_18, %c128_19] : memref<16x384xf32, #tpu.memory_space<vmem>>, vector<16x256xf32>
    %c0_20 = arith.constant 0 : index
    %c0_21 = arith.constant 0 : index
    %20 = vector.load %arg5[%c0_20, %c0_21] : memref<256x128xf32, #tpu.memory_space<vmem>>, vector<256x128xf32>
    %cst_22 = arith.constant dense<0.000000e+00> : vector<16x128xf32>
    %21 = tpu.matmul %19, %20, %cst_22 {dimension_numbers = #tpu.dot_dimension_numbers<[1], [0], [0], [1], [0, 0, 1, 1], [], []>} : vector<16x256xf32>, vector<256x128xf32>, vector<16x128xf32> -> vector<16x128xf32>
    %22 = vector.broadcast %13 : vector<1x128xf32> to vector<16x128xf32>
    %23 = arith.addf %21, %22 : vector<16x128xf32>
    %c0_23 = arith.constant 0 : index
    %c0_24 = arith.constant 0 : index
    %c0_25 = arith.constant 0 : index
    %24 = vector.load %arg7[%c0_23, %c0_24, %c0_25] : memref<1x16x256xf32, #tpu.memory_space<vmem>>, vector<1x16x128xf32>
    %25 = vector.shape_cast %24 : vector<1x16x128xf32> to vector<16x128xf32>
    %26 = vector.shape_cast %18 : vector<16x128xf32> to vector<1x16x128xf32>
    tpu.vector_store %arg7[%c0_23, %c0_24, %c0_25], %26 {strides = array<i32>} : memref<1x16x256xf32, #tpu.memory_space<vmem>>, vector<1x16x128xf32>,
    %c0_26 = arith.constant 0 : index
    %c0_27 = arith.constant 0 : index
    %c128_28 = arith.constant 128 : index
    %27 = vector.load %arg7[%c0_26, %c0_27, %c128_28] : memref<1x16x256xf32, #tpu.memory_space<vmem>>, vector<1x16x128xf32>
    %28 = vector.shape_cast %27 : vector<1x16x128xf32> to vector<16x128xf32>
    %29 = vector.shape_cast %23 : vector<16x128xf32> to vector<1x16x128xf32>
    tpu.vector_store %arg7[%c0_26, %c0_27, %c128_28], %29 {strides = array<i32>} : memref<1x16x256xf32, #tpu.memory_space<vmem>>, vector<1x16x128xf32>,
    return
  }
  func.func @transform_0(%arg0: i32, %arg1: i32) -> (i32, i32, i32) {
    %c0_i32 = arith.constant 0 : i32
    %c0_i32_0 = arith.constant 0 : i32
    return %arg0, %arg1, %c0_i32 : i32, i32, i32
  }
  func.func @transform_1(%arg0: i32, %arg1: i32) -> (i32, i32, i32, i32) {
    %c0_i32 = arith.constant 0 : i32
    %c0_i32_0 = arith.constant 0 : i32
    %c0_i32_1 = arith.constant 0 : i32
    return %arg0, %arg1, %c0_i32, %c0_i32_0 : i32, i32, i32, i32
  }
  func.func @transform_2(%arg0: i32, %arg1: i32) -> (i32, i32) {
    %c0_i32 = arith.constant 0 : i32
    %c0_i32_0 = arith.constant 0 : i32
    %c0_i32_1 = arith.constant 0 : i32
    return %c0_i32, %c0_i32_0 : i32, i32
  }
  func.func @transform_3(%arg0: i32, %arg1: i32) -> (i32, i32) {
    %c0_i32 = arith.constant 0 : i32
    %c0_i32_0 = arith.constant 0 : i32
    %c0_i32_1 = arith.constant 0 : i32
    return %c0_i32, %c0_i32_0 : i32, i32
  }
  func.func @transform_4(%arg0: i32, %arg1: i32) -> (i32, i32) {
    %c0_i32 = arith.constant 0 : i32
    %c0_i32_0 = arith.constant 0 : i32
    %c0_i32_1 = arith.constant 0 : i32
    return %c0_i32, %c0_i32_0 : i32, i32
  }
  func.func @transform_5(%arg0: i32, %arg1: i32) -> (i32, i32, i32) {
    %c0_i32 = arith.constant 0 : i32
    %c0_i32_0 = arith.constant 0 : i32
    return %arg0, %arg1, %c0_i32 : i32, i32, i32
  }
}

</mosaic_0001>

<bundles_post_ra>
// kernel: tpu_custom_call.1
= control target key start
LH: loop header
LB: loop body
LE: loop exit
PB: predicated region body
PF: predicated region fallthrough
CT: control target
= control target key end

     0   :  { %s1563_s0 = inlined_call_operand.hbm [shape: f32[2,16,128], index: 0, kind: input, shape index: {}]   ;;  %s1564_s1 = inlined_call_operand.hbm [shape: f32[2,1,2,128], index: 1, kind: input, shape index: {}]   ;;  %s1565_s2 = inlined_call_operand.hbm [shape: f32[256,128], index: 2, kind: input, shape index: {}]   ;;  %s1566_s3 = inlined_call_operand.hbm [shape: f32[256,128], index: 3, kind: input, shape index: {}]   ;;  %s1567_s4 = inlined_call_operand.vmem [shape: f32[1,128], index: 4, kind: input, shape index: {}]   ;;  %s1568_s5 = inlined_call_operand.hbm [shape: f32[2,16,256], index: 5, kind: output, shape index: {}]  }
   0x1   :  { %1576 = sst [smem:[#allocation19_spill]] %s1563_s0 }
   0x2   :  { %1577 = sst [smem:[#allocation20_spill]] %s1565_s2 }
   0x3   :  { %1578 = sst [smem:[#allocation21_spill]] %s1566_s3 }
   0x4   :  { %10 = vsyncpa [#allocation4], 0 }
   0x5   :  { %12 = vsyncpa [#allocation4 + $0x1], 0 }
   0x6   :  { %13 = vsyncpa [#allocation7], 0 }
   0x7   :  { %15 = vsyncpa [#allocation7 + $0x1], 0 }
   0x8   :  { %16 = vsyncpa [#allocation10], 0 }
   0x9   :  { %17 = vsyncpa [#allocation5], 0 }
   0xa   :  { %19 = vsyncpa [#allocation5 + $0x1], 0  ;;  %s1248_s18 = smov 0   ;;  %s1250_s19 = smov 0  }
   0xb   :  { %s1252_s20 = smov 0   ;;  %s1254_s21 = smov 0  }
   0xc   :  { %s1256_s22 = smov 0   ;;  %s1258_s23 = smov 0  }
   0xd LB: > { %s1279_s24 = sadd.s32 4294967295, %s1207_s23   ;;  %s741_s25 = sadd.s32 4294967294, %s1207_s23   ;;  %s1207_s23 = sphi %s1258_s23, %s25_s23   ;;  %s1203_s22 = sphi %s1256_s22, %s1609_s22   ;;  %s1199_s21 = sphi %s1254_s21, %s1608_s21   ;;  %s1195_s20 = sphi %s1252_s20, %s1607_s20   ;;  %s1191_s19 = sphi %s1250_s19, %s1606_s19   ;;  %s1187_s18 = sphi %s1248_s18, %s1605_s18  }
   0xe   : > { %p59_p0 = scmp.ne.s32.totalorder %s1191_s19, %s1187_s18  ;;  %p1569_p1 = scmp.eq.s32.totalorder %s1279_s24, 0 }
   0xf   : > { %p182_p3 = scmp.eq.s32.totalorder %s741_s25, 1  ;;  %p742_p5 = scmp.ge.s32.totalorder %s1207_s23, 1 }
  0x10   : > { %p1288_p4 = por %p1569_p1, %p59_p0  ;;  %p189_p7 = scmp.lt.s32.totalorder %s1207_s23, 3 }
  0x11   : > { %p1293_p6 = por %p182_p3, %p59_p0  ;;  %s1209_s29 = smov [#allocation8]  }
  0x12   : > { %s1579_s26 = scalar_select %p1288_p4, 1, 0 }
  0x13   : > { %s1580_s27 = scalar_select %p1293_p6, 1, 0 }
  0x14   : > { %p1298_p8 = pnand %p742_p5, %p189_p7  ;;  %s201_s30 = sshll.u32 %s1209_s29, 4  ;;  %s1302_s30 = int_to_ptr.vmem [resolvable:$true] %s201_s30 }
  0x15   : > { %s1210_s7 = smov [#allocation9]   ;;  %s1583_s2 = sld [smem:[#allocation20_spill]] }
  0x16   : > { %s1581_s28 = scalar_select %p1298_p8, 1, 0 }
  0x17   : > { %p919_p9 = pneg %p1298_p8  ;;  %s214_s8 = sshll.u32 %s1210_s7, 4  ;;  %s1313_s8 = int_to_ptr.vmem [resolvable:$true] %s214_s8 }
  0x19   : > { %p1309_p11 = pnand %p919_p9, %p1569_p1 }
  0x1b   : > { %s997_s11 = scalar_lea.hbm %s1583_s2, 4096  ;;  %p999_p13 = pneg %p1309_p11 }
  0x1c   : > { %p998_p12 = scmp.ne.s32.totalorder %s1583_s2, %s997_s11  ;;  %p1004_p5 = scmp.lt.u32.totalorder %s997_s11, %s1583_s2 }
  0x1e   : > { %p1000_p0 = pnand %p999_p13, %p998_p12 }
  0x20   : > { %p1001_p3 = pneg %p1000_p0 }
  0x22   : > { %p1006_p7 = pnand %p1004_p5, %p1001_p3 }
  0x24   : > { %1009 = shalt.err (!%p1006_p7)
}
  0x25   : > { %s1010_s16 = scalar_lea.vmem %s1302_s30, 4096  ;;  %p1018_p2 = scmp.lt.s32.totalorder %s1302_s30, %s1302_s30 }
  0x26   : > { %p1011_p9 = scmp.ne.s32.totalorder %s1302_s30, %s1010_s16  ;;  %p1019_p12 = scmp.lt.s32.totalorder %s1010_s16, %s1010_s16 }
  0x28   : > { %p1013_p10 = pnand %p1011_p9, %p999_p13  ;;  %p1020_p0 = por %p1019_p12, %p1018_p2 }
  0x2a   : > { %p1014_p1 = pneg %p1013_p10 }
  0x2c   : > { %p1021_p6 = pnand %p1020_p0, %p1014_p1 }
  0x2e   : > { %1024 = shalt.err (!%p1021_p6)
}
  0x2f   : > { %s1570_s17 = smov 128   ;;  %s1571_s25 = smov 8  }
  0x30   : > { %922 = dma.hbm_to_vmem [thread:$0]  (!%p1309_p11), %s1583_s2, 4096, %s1302_s30, [#allocation7], %s1570_s17, %s1570_s17, %s1571_s25  }
  0x31   : > { %s1584_s3 = sld [smem:[#allocation21_spill]] }
  0x37   : > { %s1025_s11 = scalar_lea.hbm %s1584_s3, 4096 }
  0x38   : > { %p1026_p1 = scmp.ne.s32.totalorder %s1584_s3, %s1025_s11  ;;  %p1032_p10 = scmp.lt.u32.totalorder %s1025_s11, %s1584_s3 }
  0x3a   : > { %p1028_p2 = pnand %p1026_p1, %p999_p13 }
  0x3c   : > { %p1029_p6 = pneg %p1028_p2 }
  0x3e   : > { %p1034_p3 = pnand %p1032_p10, %p1029_p6 }
  0x40   : > { %1037 = shalt.err (!%p1034_p3)
}
  0x41   : > { %s1038_s30 = scalar_lea.vmem %s1313_s8, 4096  ;;  %p1046_p12 = scmp.lt.s32.totalorder %s1313_s8, %s1313_s8 }
  0x42   : > { %p1039_p5 = scmp.ne.s32.totalorder %s1313_s8, %s1038_s30  ;;  %p1047_p0 = scmp.lt.s32.totalorder %s1038_s30, %s1038_s30 }
  0x44   : > { %p1041_p7 = pnand %p1039_p5, %p999_p13  ;;  %p1048_p1 = por %p1047_p0, %p1046_p12 }
  0x46   : > { %p1042_p9 = pneg %p1041_p7 }
  0x48   : > { %p1049_p2 = pnand %p1048_p1, %p1042_p9 }
  0x4a   : > { %1052 = shalt.err (!%p1049_p2)
}
  0x4b   : > { %925 = dma.hbm_to_vmem [thread:$0]  (!%p1309_p11), %s1584_s3, 4096, %s1313_s8, [#allocation10], %s1570_s17, %s1570_s17, %s1571_s25  }
  0x4c   : > { %s37_s6 = sadd.s32 1, %s1203_s22  ;;  %s46_s7 = sadd.s32 1, %s1195_s20 }
  0x4d   : > { %p39_p13 = scmp.ge.s32.totalorder %s37_s6, 2  ;;  %p53_p6 = scmp.ne.s32.totalorder %s1195_s20, %s1191_s19 }
  0x4e   : > { %p54_p10 = scmp.eq.s32.totalorder %s1207_s23, 0  ;;  %p939_p3 = scmp.lt.s32.totalorder %s1207_s23, 2 }
  0x4f   : > { %s1611_s6 = smov (%p39_p13, %s37_s6), 0  ;;  %p1586_p7 = scmp.eq.s32.totalorder %s1279_s24, 1 }
  0x50   : > { %1585 = sst [smem:[#allocation17_spill]] %s1611_s6  ;;  %p55_p5 = por %p54_p10, %p53_p6 }
  0x51   : > { %p1383_p9 = por %p1586_p7, %p53_p6  ;;  %s41_s10 = ssub.s32 %s1203_s22, %s1611_s6 }
  0x52   : > { %s1390_s11 = sand.u32 1, %s1195_s20   ;;  %p44_p11 = scmp.eq.s32.totalorder %s41_s10, 0 }
  0x53   : > { %s1587_s9 = scalar_select %p1383_p9, 1, 0 }
  0x54   : > { %s746_s8 = sshll.u32 %s1390_s11, 4  ;;  %s763_s12 = sshll.u32 %s1203_s22, 8 }
  0x55   : > { %s1395_s13 = scalar_select %p44_p11, %s1195_s20, %s46_s7  }
  0x56   : > { %s1589_s0 = sld [smem:[#allocation19_spill]]  ;;  %s235_s16 = scalar_lea.vmem [#allocation3], %s746_s8 }
  0x57   : > { %1588 = sst [smem:[#allocation18_spill]] %s1395_s13  ;;  %s244_s29 = sshll.u32 %s235_s16, 4  ;;  %s1408_s29 = int_to_ptr.vmem [resolvable:$true] %s244_s29 }
  0x58   : > { %p1404_p12 = pnand %p939_p3, %p55_p5  ;;  %s232_s10 = scalar_lea.sflag [#allocation4], %s1390_s11 }
  0x5a   : > { %p1055_p1 = pneg %p1404_p12 }
  0x5c   : > { %s1400_s30 = scalar_lea.hbm %s1589_s0, %s763_s12  ;;  %s1058_s15 = scalar_lea.hbm %s1589_s0, 512 }
  0x5d   : > { %s1053_s14 = scalar_lea.hbm %s1400_s30, 256  ;;  %p1059_p6 = scmp.lt.u32.totalorder %s1400_s30, %s1589_s0 }
  0x5e   : > { %p1054_p0 = scmp.ne.s32.totalorder %s1400_s30, %s1053_s14  ;;  %p1060_p10 = scmp.lt.u32.totalorder %s1058_s15, %s1053_s14 }
  0x5f   : > { %p1062_p5 = scmp.lt.u32.totalorder %s1053_s14, %s1400_s30 }
  0x60   : > { %p1056_p2 = pnand %p1055_p1, %p1054_p0  ;;  %p1061_p3 = por %p1060_p10, %p1059_p6 }
  0x62   : > { %p1057_p13 = pneg %p1056_p2  ;;  %p1063_p7 = por %p1062_p5, %p1061_p3 }
  0x64   : > { %p1064_p11 = pnand %p1063_p7, %p1057_p13 }
  0x66   : > { %1067 = shalt.err (!%p1064_p11)
}
  0x67   : > { %s1068_s7 = scalar_lea.vmem %s1408_s29, 256  ;;  %s1213_s8 = smov [#allocation3]  }
  0x68   : > { %p1069_p0 = scmp.ne.s32.totalorder %s1408_s29, %s1068_s7  ;;  %s1073_s12 = sshll.u32 %s1213_s8, 4  ;;  %s1074_s12 = int_to_ptr.vmem [resolvable:$false] %s1073_s12 }
  0x69   : > { %s1075_s25 = scalar_lea.vmem %s1074_s12, 512  ;;  %p1076_p4 = scmp.lt.s32.totalorder %s1408_s29, %s1074_s12 }
  0x6a   : > { %p1071_p2 = pnand %p1069_p0, %p1055_p1  ;;  %p1077_p6 = scmp.lt.s32.totalorder %s1075_s25, %s1068_s7 }
  0x6c   : > { %p1072_p9 = pneg %p1071_p2  ;;  %p1078_p10 = por %p1077_p6, %p1076_p4 }
  0x6e   : > { %p1079_p3 = pnand %p1078_p10, %p1072_p9 }
  0x70   : > { %1082 = shalt.err (!%p1079_p3)
}
  0x71   : > { %s1591_s14 = smov 8   ;;  %s1592_s15 = smov 128  }
  0x72   : > { %929 = dma.hbm_to_vmem [thread:$0]  (!%p1404_p12), %s1400_s30, 256, %s1408_s29, %s232_s10, %s1592_s15, %s1592_s15, %s1591_s14  }
  0x73   : > { %s749_s16 = sshll.u32 %s1390_s11, 1  ;;  %s750_s8 = sshll.u32 %s1203_s22, 5 }
  0x74   : > { %s1447_s25 = scalar_lea.hbm %s1564_s1, %s750_s8  ;;  %s258_s0 = scalar_lea.vmem [#allocation6], %s749_s16 }
  0x75   : > { %s266_s2 = sshll.u32 %s258_s0, 4  ;;  %s1593_s3 = sand.u32 1, %s1207_s23   ;;  %s267_s2 = int_to_ptr.vmem [resolvable:$true] %s266_s2 }
  0x76   : > { %s255_s6 = scalar_lea.sflag [#allocation7], %s1593_s3  ;;  %s1083_s13 = scalar_lea.hbm %s1447_s25, 32 }
  0x77   : > { %p1084_p4 = scmp.ne.s32.totalorder %s1447_s25, %s1083_s13  ;;  %s1088_s29 = scalar_lea.hbm %s1564_s1, 64 }
  0x78   : > { %p1089_p5 = scmp.lt.u32.totalorder %s1447_s25, %s1564_s1  ;;  %p1090_p7 = scmp.lt.u32.totalorder %s1088_s29, %s1083_s13 }
  0x79   : > { %p1086_p9 = pnand %p1084_p4, %p1055_p1  ;;  %p1092_p0 = scmp.lt.u32.totalorder %s1083_s13, %s1447_s25 }
  0x7a   : > { %p1091_p11 = por %p1090_p7, %p1089_p5 }
  0x7b   : > { %p1087_p13 = pneg %p1086_p9 }
  0x7c   : > { %p1093_p2 = por %p1092_p0, %p1091_p11 }
  0x7e   : > { %p1094_p6 = pnand %p1093_p2, %p1087_p13 }
  0x80   : > { %1097 = shalt.err (!%p1094_p6)
}
  0x81   : > { %s1098_s0 = scalar_lea.vmem %s267_s2, 32  ;;  %s1214_s3 = smov [#allocation6]  }
  0x82   : > { %p1099_p10 = scmp.ne.s32.totalorder %s267_s2, %s1098_s0  ;;  %s1103_s15 = sshll.u32 %s1214_s3, 4  ;;  %s1104_s15 = int_to_ptr.vmem [resolvable:$false] %s1103_s15 }
  0x83   : > { %s1105_s16 = scalar_lea.vmem %s1104_s15, 64  ;;  %p1106_p9 = scmp.lt.s32.totalorder %s267_s2, %s1104_s15 }
  0x84   : > { %p1101_p3 = pnand %p1099_p10, %p1055_p1  ;;  %p1107_p8 = scmp.lt.s32.totalorder %s1105_s16, %s1098_s0 }
  0x86   : > { %p1102_p4 = pneg %p1101_p3  ;;  %p1108_p5 = por %p1107_p8, %p1106_p9 }
  0x88   : > { %p1109_p7 = pnand %p1108_p5, %p1102_p4 }
  0x8a   : > { %1112 = shalt.err (!%p1109_p7)
}
  0x8b   : > { %932 = dma.hbm_to_vmem [thread:$0]  (!%p1404_p12), %s1447_s25, 32, %s267_s2, %s255_s6  }
  0x8c   : > { %p1594_p13 = scmp.ne.s32.totalorder %s1581_s28, 0 }
  0x8d   : > { %s1473_s13 = sand.u32 (!%p1594_p13), 1, %s1191_s19   ;;  %p1595_p8 = scmp.ne.s32.totalorder (!%p1594_p13), %s1579_s26, 0 }
  0x8e   : > { %275 = sbr.rel (%p1594_p13) target bundleno = 433 (0x1b1), region = 40  ;;  %s752_s8 = sshll.u32 (!%p1594_p13), %s1473_s13, 4 }
  0x8f   : > { %s278_s7 = scalar_lea.sflag (!%p1594_p13), [#allocation4], %s1473_s13  ;;  %s1477_s12 = scalar_lea.vmem (!%p1594_p13), [#allocation3], %s752_s8 }
  0x95   : > { %1166 = dma.done.wait (%p1595_p8), %s278_s7, 256  }
  0x96   : > { %1168 = vsyncadd (%p1595_p8), %s278_s7, 4294967040  ;;  %s286_s2 = sand.u32 1, %s1279_s24   ;;  %s753_s28 = sshll.u32 %s1473_s13, 1 }
  0x97   : > { %s287_s17 = scalar_lea.sflag [#allocation7], %s286_s2  ;;  %s1485_s6 = scalar_lea.vmem [#allocation6], %s753_s28 }
  0x98   : > { %1170 = dma.done.wait (%p1595_p8), %s287_s17, 32  }
  0x99   : > { %1172 = vsyncadd (%p1595_p8), %s287_s17, 4294967264  ;;  %p1596_p12 = scmp.eq.s32.totalorder %s1279_s24, 0 }
  0x9b   : > { %1174 = dma.done.wait (%p1596_p12), [#allocation7], 4096   ;;  %p1597_p1 = pmov %p1596_p12 }
  0x9d   : > { %1176 = vsyncadd (%p1597_p1), [#allocation7], 4294963200  ;;  %p1598_p11 = pmov %p1597_p1 }
  0x9e   : > { %p1599_p0 = pmov %p1597_p1 }
  0x9f   : > { %1178 = dma.done.wait (%p1598_p11), [#allocation10], 4096  }
  0xa0   : > { %1180 = vsyncadd (%p1599_p0), [#allocation10], 4294963200  ;;  %v381_v0 = vld [vmem:[#allocation8 + $0x80] sm:$0xff]  ;;  %v382_v1 = vld [vmem:[#allocation8 + $0x88] sm:$0xff]  ;;  %vm348_vm0 = vcmask 1046528   ;;  %vm340_vm1 = vcmask 1040384  }
  0xa1   : > { %v498_v2 = vld [vmem:[#allocation9 + $0x80] sm:$0xff]  ;;  %v841_v3 = vpack.c.bf16 %v382_v1, %v381_v0  ;;  %v499_v4 = vld [vmem:[#allocation9 + $0x88] sm:$0xff]  ;;  %v383_v11 = vld [vmem:[#allocation8 + $0x90] sm:$0xff]  ;;  %s756_s24 = sshll.u32 %s1473_s13, 5  ;;  %s764_s29 = sshll.u32 %s1199_s21, 9 }
  0xa2   : > { %v365_v5 = vld [vmem:[#allocation8] sm:$0xff]  ;;  %v366_v6 = vld [vmem:[#allocation8 + $0x8] sm:$0xff]  ;;  %v873_v7 = vpack.c.bf16 %v499_v4, %v498_v2  ;;  %v384_v13 = vld [vmem:[#allocation8 + $0x98] sm:$0xff]  ;;  %s329_s11 = scalar_lea.vmem [#allocation11], %s756_s24  ;;  %s1514_s0 = scalar_lea.hbm %s1568_s5, %s764_s29 }
  0xa3   : > { %v843_v8 = vpack.c.bf16 %v366_v6, %v365_v5  ;;  %v482_v9 = vld [vmem:[#allocation9] sm:$0xff]  ;;  %v483_v10 = vld [vmem:[#allocation9 + $0x8] sm:$0xff]  ;;  %842 = vmatprep.subr.bf16.mxu0 %v841_v3  ;;  %v500_v14 = vld [vmem:[#allocation9 + $0x90] sm:$0xff]  ;;  %v845_v16 = vpack.c.bf16 %v384_v13, %v383_v11  ;;  %s610_s30 = sshll.u32 %s329_s11, 4  ;;  %s594_s21 = scalar_lea.sflag [#allocation5], %s1473_s13  ;;  %s1509_s30 = int_to_ptr.vmem [resolvable:$true] %s610_s30 }
  0xa4   : > { %v875_v12 = vpack.c.bf16 %v483_v10, %v482_v9  ;;  %v501_v15 = vld [vmem:[#allocation9 + $0x98] sm:$0xff]  ;;  %874 = vmatprep.subr.bf16.mxu1 %v873_v7  ;;  %v367_v18 = vld [vmem:[#allocation8 + $0x10] sm:$0xff]  ;;  %v385_v23 = vld [vmem:[#allocation8 + $0xa0] sm:$0xff]  ;;  %s1113_s3 = scalar_lea.vmem %s1509_s30, 512  ;;  %p1600_p6 = scmp.ne.s32.totalorder %s1587_s9, 0 }
  0xa5   : > { %844 = vmatpush3.bf16.msra.mxu0 %v843_v8  ;;  %v877_v17 = vpack.c.bf16 %v501_v15, %v500_v14  ;;  %v368_v19 = vld [vmem:[#allocation8 + $0x18] sm:$0xff]  ;;  %v484_v20 = vld [vmem:[#allocation9 + $0x10] sm:$0xff]  ;;  %v386_v24 = vld [vmem:[#allocation8 + $0xa8] sm:$0xff]  ;;  %p1114_p2 = scmp.ne.s32.totalorder %s1509_s30, %s1113_s3  ;;  %s1215_s15 = smov [#allocation11]  }
  0xa6   : > { %876 = vmatpush3.bf16.msra.mxu1 %v875_v12  ;;  %v847_v21 = vpack.c.bf16 %v368_v19, %v367_v18  ;;  %v485_v22 = vld [vmem:[#allocation9 + $0x18] sm:$0xff]  ;;  %846 = vmatprep.subr.bf16.mxu0 %v845_v16  ;;  %v849_v26 = vpack.c.bf16 %v386_v24, %v385_v23  ;;  %v502_v27 = vld [vmem:[#allocation9 + $0xa0] sm:$0xff]  ;;  %v503_v28 = vld [vmem:[#allocation9 + $0xa8] sm:$0xff]  ;;  %s1117_s16 = sshll.u32 %s1215_s15, 4  ;;  %s1118_s16 = int_to_ptr.vmem [resolvable:$false] %s1117_s16 }
  0xa7   : > { %878 = vmatprep.subr.bf16.mxu1 %v877_v17  ;;  %v879_v25 = vpack.c.bf16 %v485_v22, %v484_v20  ;;  %v369_v29 = vld [vmem:[#allocation8 + $0x20] sm:$0xff]  ;;  %v881_v30 = vpack.c.bf16 %v503_v28, %v502_v27  ;;  %v370_v31 = vld [vmem:[#allocation8 + $0x28] sm:$0xff]  ;;  %v387_v35 = vld [vmem:[#allocation8 + $0xb0] sm:$0xff]  ;;  %p1115_p10 = pnand %p1114_p2, %p1600_p6  ;;  %s1119_s8 = scalar_lea.vmem %s1118_s16, 1024 }
  0xa8   : > { %v486_v32 = vld [vmem:[#allocation9 + $0x20] sm:$0xff]  ;;  %v487_v33 = vld [vmem:[#allocation9 + $0x28] sm:$0xff]  ;;  %v851_v34 = vpack.c.bf16 %v370_v31, %v369_v29  ;;  %v388_v36 = vld [vmem:[#allocation8 + $0xb8] sm:$0xff]  ;;  %p1120_p4 = scmp.lt.s32.totalorder %s1509_s30, %s1118_s16  ;;  %p1121_p9 = scmp.lt.s32.totalorder %s1119_s8, %s1113_s3 }
  0xa9   : > { %848 = vmatpush3.bf16.msra.mxu0 %v847_v21  ;;  %v504_v37 = vld [vmem:[#allocation9 + $0xb0] sm:$0xff]  ;;  %v883_v38 = vpack.c.bf16 %v487_v33, %v486_v32  ;;  %v853_v39 = vpack.c.bf16 %v388_v36, %v387_v35  ;;  %v505_v40 = vld [vmem:[#allocation9 + $0xb8] sm:$0xff]  ;;  %v389_v46 = vld [vmem:[#allocation8 + $0xc0] sm:$0xff]  ;;  %p1116_p3 = pneg %p1115_p10 }
  0xaa   : > { %880 = vmatpush3.bf16.msra.mxu1 %v879_v25  ;;  %850 = vmatprep.subr.bf16.mxu0 %v849_v26  ;;  %v371_v41 = vld [vmem:[#allocation8 + $0x30] sm:$0xff]  ;;  %v372_v42 = vld [vmem:[#allocation8 + $0x38] sm:$0xff]  ;;  %v885_v43 = vpack.c.bf16 %v505_v40, %v504_v37  ;;  %v390_v47 = vld [vmem:[#allocation8 + $0xc8] sm:$0xff]  ;;  %p1122_p5 = por %p1121_p9, %p1120_p4 }
  0xab   : > { %882 = vmatprep.subr.bf16.mxu1 %v881_v30  ;;  %v488_v44 = vld [vmem:[#allocation9 + $0x30] sm:$0xff]  ;;  %v489_v45 = vld [vmem:[#allocation9 + $0x38] sm:$0xff]  ;;  %v506_v48 = vld [vmem:[#allocation9 + $0xc0] sm:$0xff]  ;;  %v855_v50 = vpack.c.bf16 %v372_v42, %v371_v41  ;;  %v857_v52 = vpack.c.bf16 %v390_v47, %v389_v46 }
  0xac   : > { %v507_v49 = vld [vmem:[#allocation9 + $0xc8] sm:$0xff]  ;;  %v887_v51 = vpack.c.bf16 %v489_v45, %v488_v44  ;;  %v373_v53 = vld [vmem:[#allocation8 + $0x40] sm:$0xff]  ;;  %v391_v58 = vld [vmem:[#allocation8 + $0xd0] sm:$0xff]  ;;  %p1123_p7 = pnand %p1122_p5, %p1116_p3 }
  0xad   : > { %852 = vmatpush3.bf16.msra.mxu0 %v851_v34  ;;  %v374_v54 = vld [vmem:[#allocation8 + $0x48] sm:$0xff]  ;;  %v490_v55 = vld [vmem:[#allocation9 + $0x40] sm:$0xff]  ;;  %v889_v56 = vpack.c.bf16 %v507_v49, %v506_v48  ;;  %v392_v59 = vld [vmem:[#allocation8 + $0xd8] sm:$0xff] }
  0xae   : > { %884 = vmatpush3.bf16.msra.mxu1 %v883_v38  ;;  %854 = vmatprep.subr.bf16.mxu0 %v853_v39  ;;  %v491_v57 = vld [vmem:[#allocation9 + $0x48] sm:$0xff]  ;;  %v508_v60 = vld [vmem:[#allocation9 + $0xd0] sm:$0xff]  ;;  %v509_v61 = vld [vmem:[#allocation9 + $0xd8] sm:$0xff]  ;;  %v859_v62 = vpack.c.bf16 %v374_v54, %v373_v53  ;;  %v861_v0 = vpack.c.bf16 %v392_v59, %v391_v58 }
  0xaf   : > { %886 = vmatprep.subr.bf16.mxu1 %v885_v43  ;;  %v891_v63 = vpack.c.bf16 %v491_v57, %v490_v55  ;;  %v375_v1 = vld [vmem:[#allocation8 + $0x50] sm:$0xff]  ;;  %v376_v2 = vld [vmem:[#allocation8 + $0x58] sm:$0xff]  ;;  %v893_v4 = vpack.c.bf16 %v509_v61, %v508_v60  ;;  %v393_v6 = vld [vmem:[#allocation8 + $0xe0] sm:$0xff] }
  0xb0   : > { %v492_v3 = vld [vmem:[#allocation9 + $0x50] sm:$0xff]  ;;  %v493_v5 = vld [vmem:[#allocation9 + $0x58] sm:$0xff]  ;;  %v394_v7 = vld [vmem:[#allocation8 + $0xe8] sm:$0xff]  ;;  %v863_v11 = vpack.c.bf16 %v376_v2, %v375_v1 }
  0xb1   : > { %856 = vmatpush3.bf16.msra.mxu0 %v855_v50  ;;  %v510_v8 = vld [vmem:[#allocation9 + $0xe0] sm:$0xff]  ;;  %v511_v9 = vld [vmem:[#allocation9 + $0xe8] sm:$0xff]  ;;  %v895_v15 = vpack.c.bf16 %v493_v5, %v492_v3  ;;  %v865_v16 = vpack.c.bf16 %v394_v7, %v393_v6  ;;  %v395_v17 = vld [vmem:[#allocation8 + $0xf0] sm:$0xff] }
  0xb2   : > { %888 = vmatpush3.bf16.msra.mxu1 %v887_v51  ;;  %858 = vmatprep.subr.bf16.mxu0 %v857_v52  ;;  %v377_v10 = vld [vmem:[#allocation8 + $0x60] sm:$0xff]  ;;  %v378_v12 = vld [vmem:[#allocation8 + $0x68] sm:$0xff]  ;;  %v897_v20 = vpack.c.bf16 %v511_v9, %v510_v8  ;;  %v396_v21 = vld [vmem:[#allocation8 + $0xf8] sm:$0xff] }
  0xb3   : > { %890 = vmatprep.subr.bf16.mxu1 %v889_v56  ;;  %v494_v13 = vld [vmem:[#allocation9 + $0x60] sm:$0xff]  ;;  %v495_v14 = vld [vmem:[#allocation9 + $0x68] sm:$0xff]  ;;  %v334_v24 = vld [vmem:[%s1485_s6] sm:$0x3]  ;;  %v867_v30 = vpack.c.bf16 %v378_v12, %v377_v10  ;;  %v869_v33 = vpack.c.bf16 %v396_v21, %v395_v17 }
  0xb4   : > { %v332_v18 = vld [vmem:[%s1477_s12] sm:$0xff]  ;;  %v333_v19 = vld [vmem:[%s1477_s12 + $0x8] sm:$0xff]  ;;  %337 = vst [vmem:[#allocation2] sm:$0x1] %v334_v24  ;;  %v357_v28 = vrot.slane %v334_v24, 1  ;;  %v899_v32 = vpack.c.bf16 %v495_v14, %v494_v13 }
  0xb5   : > { %860 = vmatpush3.bf16.msra.mxu0 %v859_v62  ;;  %v349_v22 = vrot.slane %v332_v18, 1  ;;  %467 = vmatprep.mubr.f32.mxu0 %v332_v18  ;;  %v350_v23 = vrot.slane %v333_v19, 1  ;;  %v341_v25 = vrot.slane %v332_v18, 7  ;;  %v512_v26 = vld [vmem:[#allocation9 + $0xf0] sm:$0xff]  ;;  %v513_v27 = vld [vmem:[#allocation9 + $0xf8] sm:$0xff]  ;;  %v342_v29 = vrot.slane %v333_v19, 7 }
  0xb6   : > { %892 = vmatpush3.bf16.msra.mxu1 %v891_v63  ;;  %862 = vmatprep.subr.bf16.mxu0 %v861_v0  ;;  %v379_v34 = vld [vmem:[#allocation8 + $0x70] sm:$0xff]  ;;  %v380_v35 = vld [vmem:[#allocation8 + $0x78] sm:$0xff]  ;;  %359 = vst [vmem:[#allocation2 + $0x2f] sm:$0x1] %v357_v28  ;;  %v901_v37 = vpack.c.bf16 %v513_v27, %v512_v26  ;;  %v757_v46 = vld [vmem:[%s1567_s4] ss:$0 sm:$0xff] }
  0xb7   : > { %894 = vmatprep.subr.bf16.mxu1 %v893_v4  ;;  %v351_v31 = vsel %vm348_vm0, %v349_v22, %v350_v23  ;;  %355 = vst [vmem:[#allocation2 + $0x28] sm:$0x7f] %v350_v23  ;;  %346 = vst [vmem:[#allocation2] sm:$0xfe] %v341_v25  ;;  %v343_v36 = vsel %vm340_vm1, %v341_v25, %v342_v29  ;;  %v496_v38 = vld [vmem:[#allocation9 + $0x70] sm:$0xff]  ;;  %v497_v39 = vld [vmem:[#allocation9 + $0x78] sm:$0xff]  ;;  %v871_v40 = vpack.c.bf16 %v380_v35, %v379_v34 }
  0xb8   : > { %578 = vmatprep.mubr.f32.mxu1 %v351_v31  ;;  %v903_v41 = vpack.c.bf16 %v497_v39, %v496_v38 }
  0xb9   : > { %864 = vmatpush3.bf16.msra.mxu0 %v863_v11 }
  0xba   : > { %896 = vmatpush3.bf16.msra.mxu1 %v895_v15  ;;  %866 = vmatprep.subr.bf16.mxu0 %v865_v16 }
  0xbb   : > { %898 = vmatprep.subr.bf16.mxu1 %v897_v20 }
  0xbd   : > { %868 = vmatpush3.bf16.msra.mxu0 %v867_v30 }
  0xbe   : > { %900 = vmatpush3.bf16.msra.mxu1 %v899_v32  ;;  %870 = vmatprep.subr.bf16.mxu0 %v869_v33  ;;  %v361_v42 = vld [vmem:[#allocation2] sm:$0xff]  ;;  %v481_v43 = vld [vmem:[#allocation2 + $0x28] sm:$0xff] }
  0xbf   : > { %902 = vmatprep.subr.bf16.mxu1 %v901_v37 }
  0xc1   : > { %872 = vmatpush3.bf16.msra.mxu0 %v871_v40 }
  0xc2   : > { %904 = vmatpush3.bf16.msra.mxu1 %v903_v41 }
  0xc4   : > { %468 = vmatmul.mubr.f32.vlgmr.msra.gmra.mrb[0].mxu0 %v361_v42 }
  0xc5   : > { %579 = vmatmul.mubr.f32.vlgmr.msra.gmra.mrb[0].mxu1 %v332_v18  ;;  %472 = vmatprep.mubr.f32.mxu0 %v333_v19 }
  0xc6   : > { %583 = vmatprep.mubr.f32.mxu1 %v481_v43 }
  0xc8   : > { %473 = vmatmul.mubr.f32.gmra.mrb[2].mxu0 %v343_v36 }
  0xc9   : > { %584 = vmatmul.mubr.f32.gmra.mrb[2].mxu1 %v333_v19 }
 0x197   : > { %v797_v44 = vpop.f32.mrb[0].mxu0 }
 0x198   : > { %v835_v45 = vpop.f32.mrb[0].mxu1  ;;  %v798_v47 = vpop.f32.mrb[1].mxu0 }
 0x199   : > { %v799_v48 = vadd.f32 %v798_v47, %v797_v44  ;;  %v836_v49 = vpop.f32.mrb[1].mxu1 }
 0x19a   : > { %v837_v50 = vadd.f32 %v836_v49, %v835_v45 }
 0x19b   : > { %v470_v51 = vadd.f32 %v799_v48, %v757_v46  ;;  %v800_v52 = vpop.f32.mrb[2].mxu0 }
 0x19c   : > { %v581_v53 = vadd.f32 %v837_v50, %v757_v46  ;;  %v838_v54 = vpop.f32.mrb[2].mxu1  ;;  %v801_v55 = vpop.f32.mrb[3].mxu0 }
 0x19d   : > { %589 = vst [vmem:[%s329_s11] sm:$0xff] %v470_v51  ;;  %v802_v56 = vadd.f32 %v801_v55, %v800_v52  ;;  %v839_v57 = vpop.f32.mrb[3].mxu1 }
 0x19e   : > { %591 = vst [vmem:[%s329_s11 + $0x8] sm:$0xff] %v581_v53  ;;  %v840_v58 = vadd.f32 %v839_v57, %v838_v54 }
 0x19f   : > { %v475_v59 = vadd.f32 %v802_v56, %v757_v46 }
 0x1a0   : > { %v586_v60 = vadd.f32 %v840_v58, %v757_v46 }
 0x1a1   : > { %590 = vst [vmem:[%s329_s11 + $0x10] sm:$0xff] %v475_v59 }
 0x1a2   : > { %592 = vst [vmem:[%s329_s11 + $0x18] sm:$0xff] %v586_v60 }
 0x1a3   : > { %1126 = shalt.err (!%p1123_p7)
}
 0x1a4   : > { %s1127_s7 = scalar_lea.hbm %s1514_s0, 512  ;;  %s1131_s28 = scalar_lea.hbm %s1568_s5, 1024 }
 0x1a5   : > { %p1128_p13 = scmp.ne.s32.totalorder %s1514_s0, %s1127_s7  ;;  %p1132_p1 = scmp.lt.u32.totalorder %s1514_s0, %s1568_s5 }
 0x1a6   : > { %p1133_p11 = scmp.lt.u32.totalorder %s1131_s28, %s1127_s7  ;;  %p1135_p2 = scmp.lt.u32.totalorder %s1127_s7, %s1514_s0 }
 0x1a7   : > { %p1129_p8 = pnand %p1128_p13, %p1600_p6 }
 0x1a8   : > { %p1134_p0 = por %p1133_p11, %p1132_p1 }
 0x1a9   : > { %p1130_p12 = pneg %p1129_p8 }
 0x1aa   : > { %p1136_p10 = por %p1135_p2, %p1134_p0 }
 0x1ac   : > { %p1137_p3 = pnand %p1136_p10, %p1130_p12 }
 0x1ae   : > { %1140 = shalt.err (!%p1137_p3)
}
 0x1af   : > { %s1216_s24 = smov 256   ;;  %s1217_s26 = smov 16  }
 0x1b0   : > { %917 = dma.vmem_to_hbm [thread:$0]  (%p1600_p6), %s1509_s30, 512, %s1514_s0, %s594_s21, %s1216_s24, %s1216_s24, %s1217_s26  }
 0x1b1 PF: > { %s625_s25 = sand.u32 1, %s1187_s18   ;;  %p1601_p4 = scmp.ne.s32.totalorder %s1580_s27, 0 }
 0x1b2   : > { %p1602_p9 = scmp.ge.s32.totalorder %s1207_s23, 2  ;;  %s626_s11 = scalar_lea.sflag [#allocation5], %s625_s25 }
 0x1b4   : > { %p934_p5 = pnand %p1602_p9, %p1601_p4 }
 0x1b6   : > { %1182 = dma.done.wait (!%p934_p5), %s626_s11, 512  }
 0x1b7   : > { %1184 = vsyncadd (!%p934_p5), %s626_s11, 4294966784  ;;  %s25_s23 = sadd.s32 1, %s1207_s23   ;;  %s1603_s29 = sld [smem:[#allocation18_spill]] }
 0x1b8   : > { %p22_p7 = scmp.ge.s32.totalorder %s25_s23, 4   ;;  %s1604_s9 = sld [smem:[#allocation17_spill]] }
 0x1b9   : > { %s1605_s18 = smov %s1191_s19  ;;  %s1606_s19 = smov %s1195_s20 }
 0x1ba   : > { %s1608_s21 = smov %s1203_s22  ;;  %24 = sbr.rel (!%p22_p7) target bundleno = 13 (0xd), region = 106 }
 0x1bd   : > { %s1607_s20 = smov %s1603_s29 }
 0x1be   : > { %s1609_s22 = smov %s1604_s9 }
 0x1c1   :  { %631 = vsyncpa [#allocation4], 1 }
 0x1c2   :  { %633 = vsyncpa [#allocation4 + $0x1], 1 }
 0x1c3   :  { %634 = vsyncpa [#allocation7], 1 }
 0x1c4   :  { %636 = vsyncpa [#allocation7 + $0x1], 1 }
 0x1c5   :  { %637 = vsyncpa [#allocation10], 1 }
 0x1c6   :  { %638 = vsyncpa [#allocation5], 1 }
 0x1c7   :  { %640 = vsyncpa [#allocation5 + $0x1], 1 }

</bundles_post_ra>
